<compile_context>
chip_gen: v6e
topology: v6e:2x2x1
jax: 0.10.0
libtpu: 0.0.40
codegen_flags: <defaults>
</compile_context>

<pallas_src>
import functools
import math

import jax
import jax.numpy as jnp
from jax.experimental import pallas as pl
from jax.experimental.pallas import tpu as pltpu


def _seg_sum(v, m, two_pass):
    """Segmented sum of v (tm, L) over contiguous C-lane segments via a
    block-diagonal MXU matmul; the result is already broadcast back to every
    lane of its segment.  bf16 hi/lo split gives ~f32 accuracy in 2 passes."""
    v_hi = v.astype(jnp.bfloat16)
    s = jnp.dot(v_hi, m, preferred_element_type=jnp.float32)
    if two_pass:
        v_lo = (v - v_hi.astype(jnp.float32)).astype(jnp.bfloat16)
        s = s + jnp.dot(v_lo, m, preferred_element_type=jnp.float32)
    return s


def _ln_kernel_packed(x_ref, w_ref, b_ref, m_ref, o_ref, *, eps, inv_c, two_pass):
    # x_ref: (tm, L) with L = G*C lanes (G original rows per packed row).
    x = x_ref[...].astype(jnp.float32)
    m = m_ref[...]                                    # (L, L) bf16 block-diag 0/1
    mu = _seg_sum(x, m, two_pass) * inv_c             # per-lane segment mean
    xc = x - mu
    var = _seg_sum(xc * xc, m, two_pass) * inv_c      # biased var (unbiased=False)
    inv = jax.lax.rsqrt(var + eps)                    # EUP, effectively free
    o_ref[...] = (xc * inv * w_ref[...] + b_ref[...]).astype(o_ref.dtype)


def _ln_kernel_plain(x_ref, w_ref, b_ref, o_ref, *, eps, inv_c):
    # Fallback path: C already a multiple of 128, or packing not applicable.
    x = x_ref[...].astype(jnp.float32)
    mu = jnp.sum(x, axis=-1, keepdims=True) * inv_c
    xc = x - mu
    var = jnp.sum(xc * xc, axis=-1, keepdims=True) * inv_c
    inv = jax.lax.rsqrt(var + eps)
    o_ref[...] = (xc * inv * w_ref[...] + b_ref[...]).astype(o_ref.dtype)


def withbias_layernorm(x, weight, bias, *, eps=1e-5, tile_rows=None,
                       core_parallel=False):
    """x: (..., C); weight, bias: (C,). Returns same shape/dtype as x."""
    orig_shape = x.shape
    c = int(orig_shape[-1])
    rows = 1
    for d in orig_shape[:-1]:
        rows *= int(d)

    itemsize = jnp.dtype(x.dtype).itemsize
    sublane = {4: 8, 2: 16, 1: 32}.get(itemsize, 8)   # dtype-native sublane pack

    # ---- Lane packing -----------------------------------------------------
    g = 128 // math.gcd(c, 128)
    if g > 1 and (rows % g != 0 or g * c > 1024):
        # TODO(synk): split off a ragged row tail into a second unpacked call;
        # for now such shapes fall back to the unpacked (lane-padded) layout.
        g = 1
    packed = g > 1
    lanes = g * c
    rows_p = rows // g
    x2 = x.reshape(rows_p, lanes)                     # free, contiguous reshape

    # f32 params, tiled once for the packed layout (no per-step cast/bcast).
    w2 = jnp.tile(weight.astype(jnp.float32).reshape(1, c), (1, g))
    b2 = jnp.tile(bias.astype(jnp.float32).reshape(1, c), (1, g))

    # ---- Tile sizing (useful-bytes based, VMEM aware) -----------------------
    lane_pad = lanes if lanes % 128 == 0 else ((lanes + 127) // 128) * 128
    plane_budget = int(2.5 * (1 << 20))               # one f32 (tm, lane_pad) plane
    if tile_rows is None:
        tile_rows = max(sublane, plane_budget // (lane_pad * 4))
    tm = min(int(tile_rows), rows_p)
    if tm < rows_p:
        tm = max(sublane, (tm // sublane) * sublane)  # (8,128)-rule / dtype pack
    grid = pl.cdiv(rows_p, tm)   # ragged last block: garbage rows are computed
                                 # on padding but never written back (row-indep).

    in_specs = [
        pl.BlockSpec((tm, lanes), lambda i: (i, 0)),
        pl.BlockSpec((1, lanes), lambda i: (0, 0)),
        pl.BlockSpec((1, lanes), lambda i: (0, 0)),
    ]
    operands = [x2, w2, b2]
    if packed:
        seg = jnp.arange(lanes, dtype=jnp.int32) // c
        m_mat = (seg[:, None] == seg[None, :]).astype(jnp.bfloat16)   # (L, L)
        in_specs.append(pl.BlockSpec((lanes, lanes), lambda i: (0, 0)))
        operands.append(m_mat)
        kernel = functools.partial(_ln_kernel_packed, eps=float(eps),
                                   inv_c=1.0 / c, two_pass=(itemsize >= 4))
    else:
        kernel = functools.partial(_ln_kernel_plain, eps=float(eps), inv_c=1.0 / c)

    # Scoped VMEM: 2x(in)+2x(out) block buffers + f32 temporaries + headroom.
    blk_bytes = tm * lane_pad * itemsize
    plane_f32 = tm * lane_pad * 4
    m_bytes = (lanes * lanes * 2) if packed else 0
    vmem_need = 4 * blk_bytes + 8 * plane_f32 + m_bytes + (2 << 20)
    vmem_limit = int(min(48 << 20, max(16 << 20, vmem_need)))

    n_dots = (4 if itemsize >= 4 else 2) if packed else 0
    cost = pl.CostEstimate(
        flops=int(2 * rows_p * lanes * lanes * n_dots + 12 * rows * c),
        transcendentals=int(rows_p * lanes),
        bytes_accessed=int(2 * rows * c * itemsize + 2 * lanes * 4 + m_bytes),
    )

    # "parallel" is safe everywhere; on v7x pass core_parallel=True (with an
    # even number of grid blocks) to split the row axis across the 2 TCs.
    row_sem = pltpu.CORE_PARALLEL if core_parallel else "parallel"

    out = pl.pallas_call(
        kernel,
        out_shape=jax.ShapeDtypeStruct((rows_p, lanes), x.dtype),
        grid_spec=pltpu.PrefetchScalarGridSpec(
            num_scalar_prefetch=0,
            grid=(grid,),
            in_specs=in_specs,
            out_specs=pl.BlockSpec((tm, lanes), lambda i: (i, 0)),
        ),
        compiler_params=pltpu.CompilerParams(
            dimension_semantics=(row_sem,),
            vmem_limit_bytes=vmem_limit,
        ),
        cost_estimate=cost,
    )(*operands)

    return out.reshape(orig_shape)


def _reference(x, weight, bias, eps=1e-5):
    x32 = x.astype(jnp.float32)
    mu = jnp.mean(x32, axis=-1, keepdims=True)
    var = jnp.mean((x32 - mu) ** 2, axis=-1, keepdims=True)
    return ((x32 - mu) / jnp.sqrt(var + eps) * weight.astype(jnp.float32)
            + bias.astype(jnp.float32))


if __name__ == "__main__":
    key = jax.random.PRNGKey(0)
    k1, k2, k3, k4 = jax.random.split(key, 4)

    # Restormer-style input: (B, H*W, C) channels-last tokens, norm over C.
    B, HW, C = 2, 64, 32
    x = jax.random.normal(k1, (B, HW, C), dtype=jnp.float32)
    weight = jnp.ones((C,), dtype=jnp.float32)
    bias = jnp.zeros((C,), dtype=jnp.float32)

    out = jax.block_until_ready(withbias_layernorm(x, weight, bias))
    ref = _reference(x, weight, bias)
    assert out.shape == x.shape and out.dtype == x.dtype
    assert float(jnp.max(jnp.abs(out - ref))) < 1e-4

    # Packed path with a multi-step grid and a ragged last block
    # (rows_p = 2*50/4 = 25, tile_rows=16 -> grid 2) + non-trivial affine.
    x2 = jax.random.normal(k2, (2, 50, C), dtype=jnp.float32)
    w2 = 0.5 + 0.01 * jnp.arange(C, dtype=jnp.float32)
    b2 = 0.1 * jnp.arange(C, dtype=jnp.float32)
    out2 = jax.block_until_ready(withbias_layernorm(x2, w2, b2, tile_rows=16))
    assert out2.shape == x2.shape and out2.dtype == x2.dtype
    assert float(jnp.max(jnp.abs(out2 - _reference(x2, w2, b2)))) < 1e-4

    # bf16 input: single-pass MXU reduce, 16-row sublane rounding.
    x3 = jax.random.normal(k3, (4, 32, C), dtype=jnp.bfloat16)
    out3 = jax.block_until_ready(withbias_layernorm(x3, w2, b2, tile_rows=16))
    assert out3.shape == x3.shape and out3.dtype == jnp.bfloat16
    assert float(jnp.max(jnp.abs(out3.astype(jnp.float32)
                                 - _reference(x3, w2, b2)))) < 3e-2

    # Row count not divisible by the packing factor -> unpacked fallback path.
    x4 = jax.random.normal(k4, (3, 7, C), dtype=jnp.float32)
    out4 = jax.block_until_ready(withbias_layernorm(x4, w2, b2))
    assert float(jnp.max(jnp.abs(out4 - _reference(x4, w2, b2)))) < 1e-4

    print("KERNEL_OK")
</pallas_src>

<mosaic_0001>
module attributes {stable_mosaic.version = 11 : i64} {
  func.func @_ln_kernel_packed(%arg0: i32, %arg1: memref<32x128xf32, #tpu.memory_space<vmem>>, %arg2: memref<1x128xf32, #tpu.memory_space<vmem>>, %arg3: memref<1x128xf32, #tpu.memory_space<vmem>>, %arg4: memref<128x128xbf16, #tpu.memory_space<vmem>>, %arg5: memref<32x128xf32, #tpu.memory_space<vmem>>) attributes {dimension_semantics = [#tpu.dimension_semantics<parallel>], iteration_bounds = array<i64: 1>, scalar_prefetch = 0 : i64, scratch_operands = 0 : i64, tpu.core_type = #tpu.core_type<tc>, window_params = [{transform_indices = @transform_0, window_bounds = array<i64: 32, 128>}, {pipeline_mode = #tpu.pipeline_mode<synchronous>, transform_indices = @transform_1, window_bounds = array<i64: 1, 128>}, {pipeline_mode = #tpu.pipeline_mode<synchronous>, transform_indices = @transform_2, window_bounds = array<i64: 1, 128>}, {pipeline_mode = #tpu.pipeline_mode<synchronous>, transform_indices = @transform_3, window_bounds = array<i64: 128, 128>}, {transform_indices = @transform_4, window_bounds = array<i64: 32, 128>}]} {
    %c0 = arith.constant 0 : index
    %c0_0 = arith.constant 0 : index
    %0 = vector.load %arg1[%c0, %c0_0] : memref<32x128xf32, #tpu.memory_space<vmem>>, vector<32x128xf32>
    %c0_1 = arith.constant 0 : index
    %c0_2 = arith.constant 0 : index
    %1 = vector.load %arg4[%c0_1, %c0_2] : memref<128x128xbf16, #tpu.memory_space<vmem>>, vector<128x128xbf16>
    %2 = arith.truncf %0 : vector<32x128xf32> to vector<32x128xbf16>
    %cst = arith.constant dense<0.000000e+00> : vector<32x128xf32>
    %3 = tpu.matmul %2, %1, %cst {dimension_numbers = #tpu.dot_dimension_numbers<[1], [0], [0], [1], [0, 0, 1, 1], [], []>} : vector<32x128xbf16>, vector<128x128xbf16>, vector<32x128xf32> -> vector<32x128xf32>
    %4 = arith.extf %2 : vector<32x128xbf16> to vector<32x128xf32>
    %5 = arith.subf %0, %4 : vector<32x128xf32>
    %6 = arith.truncf %5 : vector<32x128xf32> to vector<32x128xbf16>
    %cst_3 = arith.constant dense<0.000000e+00> : vector<32x128xf32>
    %7 = tpu.matmul %6, %1, %cst_3 {dimension_numbers = #tpu.dot_dimension_numbers<[1], [0], [0], [1], [0, 0, 1, 1], [], []>} : vector<32x128xbf16>, vector<128x128xbf16>, vector<32x128xf32> -> vector<32x128xf32>
    %8 = arith.addf %3, %7 : vector<32x128xf32>
    %cst_4 = arith.constant 3.125000e-02 : f32
    %9 = vector.broadcast %cst_4 : f32 to vector<32x128xf32>
    %10 = arith.mulf %8, %9 : vector<32x128xf32>
    %11 = arith.subf %0, %10 : vector<32x128xf32>
    %12 = arith.mulf %11, %11 : vector<32x128xf32>
    %13 = arith.truncf %12 : vector<32x128xf32> to vector<32x128xbf16>
    %cst_5 = arith.constant dense<0.000000e+00> : vector<32x128xf32>
    %14 = tpu.matmul %13, %1, %cst_5 {dimension_numbers = #tpu.dot_dimension_numbers<[1], [0], [0], [1], [0, 0, 1, 1], [], []>} : vector<32x128xbf16>, vector<128x128xbf16>, vector<32x128xf32> -> vector<32x128xf32>
    %15 = arith.extf %13 : vector<32x128xbf16> to vector<32x128xf32>
    %16 = arith.subf %12, %15 : vector<32x128xf32>
    %17 = arith.truncf %16 : vector<32x128xf32> to vector<32x128xbf16>
    %cst_6 = arith.constant dense<0.000000e+00> : vector<32x128xf32>
    %18 = tpu.matmul %17, %1, %cst_6 {dimension_numbers = #tpu.dot_dimension_numbers<[1], [0], [0], [1], [0, 0, 1, 1], [], []>} : vector<32x128xbf16>, vector<128x128xbf16>, vector<32x128xf32> -> vector<32x128xf32>
    %19 = arith.addf %14, %18 : vector<32x128xf32>
    %cst_7 = arith.constant 3.125000e-02 : f32
    %20 = vector.broadcast %cst_7 : f32 to vector<32x128xf32>
    %21 = arith.mulf %19, %20 : vector<32x128xf32>
    %cst_8 = arith.constant 9.99999974E-6 : f32
    %22 = vector.broadcast %cst_8 : f32 to vector<32x128xf32>
    %23 = arith.addf %21, %22 : vector<32x128xf32>
    %24 = math.rsqrt %23 : vector<32x128xf32>
    %25 = arith.mulf %11, %24 : vector<32x128xf32>
    %c0_9 = arith.constant 0 : index
    %c0_10 = arith.constant 0 : index
    %26 = vector.load %arg2[%c0_9, %c0_10] : memref<1x128xf32, #tpu.memory_space<vmem>>, vector<1x128xf32>
    %27 = vector.broadcast %26 : vector<1x128xf32> to vector<32x128xf32>
    %28 = arith.mulf %25, %27 : vector<32x128xf32>
    %c0_11 = arith.constant 0 : index
    %c0_12 = arith.constant 0 : index
    %29 = vector.load %arg3[%c0_11, %c0_12] : memref<1x128xf32, #tpu.memory_space<vmem>>, vector<1x128xf32>
    %30 = vector.broadcast %29 : vector<1x128xf32> to vector<32x128xf32>
    %31 = arith.addf %28, %30 : vector<32x128xf32>
    %c0_13 = arith.constant 0 : index
    %c0_14 = arith.constant 0 : index
    %32 = vector.load %arg5[%c0_13, %c0_14] : memref<32x128xf32, #tpu.memory_space<vmem>>, vector<32x128xf32>
    tpu.vector_store %arg5[%c0_13, %c0_14], %31 {strides = array<i32>} : memref<32x128xf32, #tpu.memory_space<vmem>>, vector<32x128xf32>,
    return
  }
  func.func @transform_0(%arg0: i32) -> (i32, i32) {
    %c0_i32 = arith.constant 0 : i32
    %c0_i32_0 = arith.constant 0 : i32
    return %arg0, %c0_i32 : i32, i32
  }
  func.func @transform_1(%arg0: i32) -> (i32, i32) {
    %c0_i32 = arith.constant 0 : i32
    %c0_i32_0 = arith.constant 0 : i32
    %c0_i32_1 = arith.constant 0 : i32
    return %c0_i32, %c0_i32_0 : i32, i32
  }
  func.func @transform_2(%arg0: i32) -> (i32, i32) {
    %c0_i32 = arith.constant 0 : i32
    %c0_i32_0 = arith.constant 0 : i32
    %c0_i32_1 = arith.constant 0 : i32
    return %c0_i32, %c0_i32_0 : i32, i32
  }
  func.func @transform_3(%arg0: i32) -> (i32, i32) {
    %c0_i32 = arith.constant 0 : i32
    %c0_i32_0 = arith.constant 0 : i32
    %c0_i32_1 = arith.constant 0 : i32
    return %c0_i32, %c0_i32_0 : i32, i32
  }
  func.func @transform_4(%arg0: i32) -> (i32, i32) {
    %c0_i32 = arith.constant 0 : i32
    %c0_i32_0 = arith.constant 0 : i32
    return %arg0, %c0_i32 : i32, i32
  }
}

</mosaic_0001>

<bundles_post_ra>
// kernel: tpu_custom_call.1
= control target key start
LH: loop header
LB: loop body
LE: loop exit
PB: predicated region body
PF: predicated region fallthrough
CT: control target
= control target key end

     0   :  { %9 = vsyncpa [#allocation3], 0  ;;  %s709_s0 = inlined_call_operand.hbm [shape: f32[32,128], index: 0, kind: input, shape index: {}]   ;;  %s710_s1 = inlined_call_operand.vmem [shape: f32[1,128], index: 1, kind: input, shape index: {}]   ;;  %s711_s2 = inlined_call_operand.vmem [shape: f32[1,128], index: 2, kind: input, shape index: {}]   ;;  %s712_s3 = inlined_call_operand.hbm [shape: bf16[128,128], index: 3, kind: input, shape index: {}]   ;;  %s713_s4 = inlined_call_operand.hbm [shape: f32[32,128], index: 4, kind: output, shape index: {}]  }
   0x1   :  { %10 = vsyncpa [#allocation6], 0 }
   0x2   :  { %11 = vsyncpa [#allocation4], 0  ;;  %s626_s15 = smov [#allocation2]  }
   0x3   :  { %s17_s16 = sshll.u32 %s626_s15, 4  ;;  %s18_s16 = int_to_ptr.vmem [resolvable:$true] %s17_s16 }
   0x4   :  { %s568_s17 = scalar_lea.vmem %s18_s16, 512  ;;  %p573_p1 = scmp.lt.s32.totalorder %s18_s16, %s18_s16 }
   0x5   :  { %p569_p0 = scmp.ne.s32.totalorder %s18_s16, %s568_s17  ;;  %p574_p2 = scmp.lt.s32.totalorder %s568_s17, %s568_s17 }
   0x7   :  { %p575_p3 = por %p574_p2, %p573_p1 }
   0x9   :  { %p576_p4 = pnand %p575_p3, %p569_p0 }
   0xb   :  { %579 = shalt.err (!%p576_p4)
}
   0xc   :  { %s627_s18 = smov 128   ;;  %s628_s19 = smov 8  }
   0xd   :  { %23 = dma.hbm_to_vmem [thread:$0]  %s709_s0, 512, %s18_s16, [#allocation3], %s627_s18, %s627_s18, %s628_s19  }
   0xe   :  { %s629_s22 = smov [#allocation5]  }
   0xf   :  { %s33_s23 = sshll.u32 %s629_s22, 4  ;;  %s34_s23 = int_to_ptr.vmem [resolvable:$true] %s33_s23 }
  0x10   :  { %s588_s24 = scalar_lea.vmem %s34_s23, 1024  ;;  %p593_p6 = scmp.lt.s32.totalorder %s34_s23, %s34_s23 }
  0x11   :  { %p589_p5 = scmp.ne.s32.totalorder %s34_s23, %s588_s24  ;;  %p594_p7 = scmp.lt.s32.totalorder %s588_s24, %s588_s24 }
  0x13   :  { %p595_p8 = por %p594_p7, %p593_p6 }
  0x15   :  { %p596_p9 = pnand %p595_p8, %p589_p5 }
  0x17   :  { %599 = shalt.err (!%p596_p9)
}
  0x18   :  { %s630_s25 = smov 64   ;;  %s631_s26 = smov 4  }
  0x19   :  { %39 = dma.hbm_to_vmem [thread:$0]  %s712_s3, 1024, %s34_s23, [#allocation6], %s630_s25, %s630_s25, %s631_s26  }
  0x1a   :  { %620 = dma.done.wait [#allocation3], 512  }
  0x1b   :  { %621 = vsyncadd [#allocation3], 4294966784 }
  0x1c   :  { %622 = dma.done.wait [#allocation6], 1024  }
  0x1d   :  { %623 = vsyncadd [#allocation6], 4294966272  ;;  %v544_v0 = vld [vmem:[#allocation5 + $0x38] sm:$0xff]   ;;  %v667_v1 = vld [vmem:[#allocation5 + $0x30] sm:$0xff]   ;;  %s632_s5 = smov [#allocation7]  }
  0x1e   :  { %457 = vmatprep.subr.bf16.mxu0 %v544_v0  ;;  %477 = vmatprep.subr.bf16.mxu1 %v544_v0  ;;  %v546_v2 = vld [vmem:[#allocation5 + $0x28] sm:$0xff]   ;;  %v547_v3 = vld [vmem:[#allocation5 + $0x20] sm:$0xff]   ;;  %v548_v9 = vld [vmem:[#allocation5 + $0x18] sm:$0xff]   ;;  %s394_s6 = sshll.u32 %s632_s5, 4  ;;  %s395_s6 = int_to_ptr.vmem [resolvable:$true] %s394_s6 }
  0x1f   :  { %458 = vmatpush3.bf16.msra.mxu0 %v544_v0  ;;  %478 = vmatpush3.bf16.msra.mxu1 %v544_v0  ;;  %v673_v4 = vld [vmem:[#allocation2] sm:$0xff]  ;;  %v675_v5 = vld [vmem:[#allocation2 + $0x8] sm:$0xff]  ;;  %v681_v13 = vld [vmem:[#allocation2 + $0x10] sm:$0xff]  ;;  %p605_p11 = scmp.lt.s32.totalorder %s395_s6, %s395_s6 }
  0x20   :  { %459 = vmatprep.subr.bf16.mxu0 %v667_v1  ;;  %479 = vmatprep.subr.bf16.mxu1 %v667_v1  ;;  %v67_v6 = vpack.c.bf16 %v675_v5, %v673_v4  ;;  %v683_v14 = vld [vmem:[#allocation2 + $0x18] sm:$0xff]  ;;  %v549_v15 = vld [vmem:[#allocation5 + $0x10] sm:$0xff]   ;;  %v550_v17 = vld [vmem:[#allocation5 + $0x8] sm:$0xff]  }
  0x21   :  { %v68_v16 = vpack.c.bf16 %v683_v14, %v681_v13  ;;  %v551_v20 = vld [vmem:[#allocation5] sm:$0xff]  }
  0x22   :  { %v69_v7 = vunpack.c.l.bf16 %v67_v6  ;;  %v70_v8 = vunpack.c.h.bf16 %v67_v6  ;;  %493 = vmatprep.mubr.bf16.mxu1 %v67_v6 }
  0x23   :  { %460 = vmatpush3.bf16.msra.mxu0 %v667_v1  ;;  %480 = vmatpush3.bf16.msra.mxu1 %v667_v1  ;;  %v71_v18 = vunpack.c.l.bf16 %v68_v16  ;;  %v72_v19 = vunpack.c.h.bf16 %v68_v16 }
  0x24   :  { %461 = vmatprep.subr.bf16.mxu0 %v546_v2  ;;  %481 = vmatprep.subr.bf16.mxu1 %v546_v2  ;;  %v73_v10 = vsub.f32 %v673_v4, %v69_v7  ;;  %v74_v11 = vsub.f32 %v675_v5, %v70_v8 }
  0x25   :  { %v75_v21 = vsub.f32 %v681_v13, %v71_v18  ;;  %v76_v22 = vsub.f32 %v683_v14, %v72_v19 }
  0x26   :  { %v77_v12 = vpack.c.bf16 %v74_v11, %v73_v10 }
  0x27   :  { %462 = vmatpush3.bf16.msra.mxu0 %v546_v2  ;;  %482 = vmatpush3.bf16.msra.mxu1 %v546_v2  ;;  %v78_v23 = vpack.c.bf16 %v76_v22, %v75_v21 }
  0x28   :  { %463 = vmatprep.subr.bf16.mxu0 %v547_v3  ;;  %483 = vmatprep.subr.bf16.mxu1 %v547_v3 }
  0x29   :  { %473 = vmatprep.mubr.bf16.mxu0 %v77_v12 }
  0x2b   :  { %464 = vmatpush3.bf16.msra.mxu0 %v547_v3  ;;  %484 = vmatpush3.bf16.msra.mxu1 %v547_v3 }
  0x2c   :  { %465 = vmatprep.subr.bf16.mxu0 %v548_v9  ;;  %485 = vmatprep.subr.bf16.mxu1 %v548_v9 }
  0x2f   :  { %466 = vmatpush3.bf16.msra.mxu0 %v548_v9  ;;  %486 = vmatpush3.bf16.msra.mxu1 %v548_v9 }
  0x30   :  { %467 = vmatprep.subr.bf16.mxu0 %v549_v15  ;;  %487 = vmatprep.subr.bf16.mxu1 %v549_v15 }
  0x33   :  { %468 = vmatpush3.bf16.msra.mxu0 %v549_v15  ;;  %488 = vmatpush3.bf16.msra.mxu1 %v549_v15 }
  0x34   :  { %469 = vmatprep.subr.bf16.mxu0 %v550_v17  ;;  %489 = vmatprep.subr.bf16.mxu1 %v550_v17 }
  0x37   :  { %470 = vmatpush3.bf16.msra.mxu0 %v550_v17  ;;  %490 = vmatpush3.bf16.msra.mxu1 %v550_v17 }
  0x38   :  { %471 = vmatprep.subr.bf16.mxu0 %v551_v20  ;;  %491 = vmatprep.subr.bf16.mxu1 %v551_v20 }
  0x3b   :  { %472 = vmatpush3.bf16.msra.mxu0 %v551_v20  ;;  %492 = vmatpush3.bf16.msra.mxu1 %v551_v20 }
  0x3c   :  { %517 = vmatprep.subr.bf16.mxu1 %v544_v0  ;;  %497 = vmatprep.subr.bf16.mxu0 %v544_v0 }
  0x3e   :  { %474 = vmatmul.mubr.bf16.vlgmr.msra.gmra.mxu0 %v78_v23  ;;  %494 = vmatmul.mubr.bf16.vlgmr.msra.gmra.mxu1 %v68_v16 }
  0x3f   :  { %518 = vmatpush3.bf16.msra.mxu1 %v544_v0  ;;  %498 = vmatpush3.bf16.msra.mxu0 %v544_v0 }
  0x40   :  { %519 = vmatprep.subr.bf16.mxu1 %v667_v1  ;;  %499 = vmatprep.subr.bf16.mxu0 %v667_v1 }
  0x43   :  { %520 = vmatpush3.bf16.msra.mxu1 %v667_v1  ;;  %500 = vmatpush3.bf16.msra.mxu0 %v667_v1 }
  0x44   :  { %521 = vmatprep.subr.bf16.mxu1 %v546_v2  ;;  %501 = vmatprep.subr.bf16.mxu0 %v546_v2 }
  0x47   :  { %522 = vmatpush3.bf16.msra.mxu1 %v546_v2  ;;  %502 = vmatpush3.bf16.msra.mxu0 %v546_v2 }
  0x48   :  { %523 = vmatprep.subr.bf16.mxu1 %v547_v3  ;;  %503 = vmatprep.subr.bf16.mxu0 %v547_v3 }
  0x4b   :  { %524 = vmatpush3.bf16.msra.mxu1 %v547_v3  ;;  %504 = vmatpush3.bf16.msra.mxu0 %v547_v3 }
  0x4c   :  { %525 = vmatprep.subr.bf16.mxu1 %v548_v9  ;;  %505 = vmatprep.subr.bf16.mxu0 %v548_v9 }
  0x4f   :  { %526 = vmatpush3.bf16.msra.mxu1 %v548_v9  ;;  %506 = vmatpush3.bf16.msra.mxu0 %v548_v9 }
  0x50   :  { %527 = vmatprep.subr.bf16.mxu1 %v549_v15  ;;  %507 = vmatprep.subr.bf16.mxu0 %v549_v15 }
  0x53   :  { %528 = vmatpush3.bf16.msra.mxu1 %v549_v15  ;;  %508 = vmatpush3.bf16.msra.mxu0 %v549_v15 }
  0x54   :  { %529 = vmatprep.subr.bf16.mxu1 %v550_v17  ;;  %509 = vmatprep.subr.bf16.mxu0 %v550_v17 }
  0x57   :  { %530 = vmatpush3.bf16.msra.mxu1 %v550_v17  ;;  %510 = vmatpush3.bf16.msra.mxu0 %v550_v17  ;;  %v415_v17 = vld [vmem:[%s710_s1] ss:$0 sm:$0xff]  ;;  %s600_s1 = scalar_lea.vmem %s395_s6, 512 }
  0x58   :  { %531 = vmatprep.subr.bf16.mxu1 %v551_v20  ;;  %511 = vmatprep.subr.bf16.mxu0 %v551_v20  ;;  %p601_p10 = scmp.ne.s32.totalorder %s395_s6, %s600_s1  ;;  %p606_p12 = scmp.lt.s32.totalorder %s600_s1, %s600_s1 }
  0x5a   :  { %p607_p13 = por %p606_p12, %p605_p11 }
  0x5b   :  { %532 = vmatpush3.bf16.msra.mxu1 %v551_v20  ;;  %512 = vmatpush3.bf16.msra.mxu0 %v551_v20  ;;  %v416_v20 = vld [vmem:[%s711_s2] ss:$0 sm:$0xff] }
  0x5c   :  { %p608_p0 = pnand %p607_p13, %p601_p10 }
  0xfe   :  { %v475_v24 = vpop.f32.mrf.mxu0  ;;  %v495_v25 = vpop.f32.mrf.mxu1 }
  0xff   :  { %v219_v26 = vadd.f32 %v495_v25, %v475_v24 }
 0x100   :  { %v161_v27 = vpop.f32.mrf.mxu0  ;;  %v210_v28 = vpop.f32.mrf.mxu1 }
 0x101   :  { %v227_v29 = vmul.f32 0.03125, %v219_v26  ;;  %v211_v30 = vadd.f32 %v210_v28, %v161_v27 }
 0x102   :  { %v476_v31 = vpop.f32.mrf.mxu0  ;;  %v496_v32 = vpop.f32.mrf.mxu1 }
 0x103   :  { %v225_v33 = vmul.f32 0.03125, %v211_v30  ;;  %v222_v34 = vadd.f32 %v496_v32, %v476_v31  ;;  %v231_v37 = vsub.f32 %v681_v13, %v227_v29 }
 0x104   :  { %v164_v35 = vpop.f32.mrf.mxu0  ;;  %v213_v36 = vpop.f32.mrf.mxu1 }
 0x105   :  { %v228_v38 = vmul.f32 0.03125, %v222_v34  ;;  %v214_v39 = vadd.f32 %v213_v36, %v164_v35  ;;  %v229_v40 = vsub.f32 %v673_v4, %v225_v33  ;;  %v235_v43 = vmul.f32 %v231_v37, %v231_v37 }
 0x107   :  { %v232_v41 = vsub.f32 %v683_v14, %v228_v38  ;;  %v226_v42 = vmul.f32 0.03125, %v214_v39  ;;  %v233_v46 = vmul.f32 %v229_v40, %v229_v40 }
 0x109   :  { %v236_v44 = vmul.f32 %v232_v41, %v232_v41  ;;  %v230_v45 = vsub.f32 %v675_v5, %v226_v42 }
 0x10b   :  { %v238_v47 = vpack.c.bf16 %v236_v44, %v235_v43  ;;  %v234_v48 = vmul.f32 %v230_v45, %v230_v45 }
 0x10d   :  { %v242_v49 = vunpack.c.h.bf16 %v238_v47  ;;  %v237_v50 = vpack.c.bf16 %v234_v48, %v233_v46  ;;  %v241_v51 = vunpack.c.l.bf16 %v238_v47 }
 0x10f   :  { %533 = vmatprep.mubr.bf16.mxu1 %v237_v50  ;;  %v239_v52 = vunpack.c.l.bf16 %v237_v50  ;;  %v240_v53 = vunpack.c.h.bf16 %v237_v50  ;;  %v246_v54 = vsub.f32 %v236_v44, %v242_v49  ;;  %v245_v55 = vsub.f32 %v235_v43, %v241_v51 }
 0x110   :  { %534 = vmatmul.mubr.bf16.vlgmr.msra.gmra.mxu1 %v238_v47 }
 0x111   :  { %v243_v56 = vsub.f32 %v233_v46, %v239_v52  ;;  %v244_v57 = vsub.f32 %v234_v48, %v240_v53  ;;  %v248_v59 = vpack.c.bf16 %v246_v54, %v245_v55 }
 0x113   :  { %v247_v58 = vpack.c.bf16 %v244_v57, %v243_v56 }
 0x115   :  { %513 = vmatprep.mubr.bf16.mxu0 %v247_v58 }
 0x116   :  { %514 = vmatmul.mubr.bf16.vlgmr.msra.gmra.mxu0 %v248_v59 }
 0x1d0   :  { %v535_v60 = vpop.f32.mrf.mxu1 }
 0x1d2   :  { %v332_v61 = vpop.f32.mrf.mxu1 }
 0x1d4   :  { %v536_v0 = vpop.f32.mrf.mxu1 }
 0x1d6   :  { %v515_v62 = vpop.f32.mrf.mxu0  ;;  %v335_v8 = vpop.f32.mrf.mxu1 }
 0x1d7   :  { %v341_v63 = vadd.f32 %v535_v60, %v515_v62 }
 0x1d8   :  { %v283_v1 = vpop.f32.mrf.mxu0 }
 0x1d9   :  { %v349_v2 = vmul.f32 0.03125, %v341_v63  ;;  %v333_v3 = vadd.f32 %v332_v61, %v283_v1 }
 0x1da   :  { %v516_v4 = vpop.f32.mrf.mxu0 }
 0x1db   :  { %v353_v5 = vadd.f32 1e-05, %v349_v2  ;;  %v347_v6 = vmul.f32 0.03125, %v333_v3  ;;  %v344_v7 = vadd.f32 %v536_v0, %v516_v4 }
 0x1dc   :  { %v286_v9 = vpop.f32.mrf.mxu0 }
 0x1dd   :  { %552 = vrsqrt.f32 %v353_v5  ;;  %v351_v10 = vadd.f32 1e-05, %v347_v6  ;;  %v350_v11 = vmul.f32 0.03125, %v344_v7  ;;  %v336_v12 = vadd.f32 %v335_v8, %v286_v9 }
 0x1df   :  { %554 = vrsqrt.f32 %v351_v10  ;;  %v354_v13 = vadd.f32 1e-05, %v350_v11  ;;  %v348_v14 = vmul.f32 0.03125, %v336_v12 }
 0x1e1   :  { %556 = vrsqrt.f32 %v354_v13  ;;  %v352_v15 = vadd.f32 1e-05, %v348_v14 }
 0x1e3   :  { %558 = vrsqrt.f32 %v352_v15 }
 0x1ea   :  { %v553_v16 = vpop.eup %552 }
 0x1eb   :  { %v361_v18 = vmul.f32 %v553_v16, %v231_v37 }
 0x1ec   :  { %v555_v19 = vpop.eup %554 }
 0x1ed   :  { %v359_v21 = vmul.f32 %v555_v19, %v229_v40  ;;  %v372_v22 = vmul.f32 %v415_v17, %v361_v18 }
 0x1ee   :  { %v557_v23 = vpop.eup %556 }
 0x1ef   :  { %v362_v24 = vmul.f32 %v557_v23, %v232_v41  ;;  %v370_v25 = vmul.f32 %v415_v17, %v359_v21  ;;  %v383_v26 = vadd.f32 %v416_v20, %v372_v22 }
 0x1f0   :  { %v559_v27 = vpop.eup %558 }
 0x1f1   :  { %v360_v28 = vmul.f32 %v559_v27, %v230_v45  ;;  %v373_v29 = vmul.f32 %v415_v17, %v362_v24  ;;  %v381_v30 = vadd.f32 %v416_v20, %v370_v25  ;;  %387 = vst [vmem:[#allocation7 + $0x10] sm:$0xff] %v383_v26 }
 0x1f3   :  { %v371_v31 = vmul.f32 %v415_v17, %v360_v28  ;;  %v384_v32 = vadd.f32 %v416_v20, %v373_v29  ;;  %385 = vst [vmem:[#allocation7] sm:$0xff] %v381_v30 }
 0x1f5   :  { %v382_v33 = vadd.f32 %v416_v20, %v371_v31  ;;  %388 = vst [vmem:[#allocation7 + $0x18] sm:$0xff] %v384_v32 }
 0x1f7   :  { %386 = vst [vmem:[#allocation7 + $0x8] sm:$0xff] %v382_v33 }
 0x1f8   :  { %611 = shalt.err (!%p608_p0)
}
 0x1f9   :  { %400 = dma.vmem_to_hbm [thread:$0]  %s395_s6, 512, %s713_s4, [#allocation4], %s627_s18, %s627_s18, %s628_s19  }
 0x1fa   :  { %624 = dma.done.wait [#allocation4], 512  }
 0x1fb   :  { %625 = vsyncadd [#allocation4], 4294966784 }
 0x1fc   :  { %404 = vsyncpa [#allocation3], 1 }
 0x1fd   :  { %405 = vsyncpa [#allocation6], 1 }
 0x1fe   :  { %406 = vsyncpa [#allocation4], 1 }

</bundles_post_ra>
